<compile_context>
chip_gen: v7x
topology: tpu7x:2x2x1
jax: 0.10.0
libtpu: 0.0.40
codegen_flags: <defaults>
</compile_context>

<pallas_src>
import functools
import math

import numpy as np
import jax
import jax.numpy as jnp
from jax.experimental import pallas as pl
from jax.experimental.pallas import tpu as pltpu

_INV_SQRT2 = 0.7071067811865476
# Abramowitz & Stegun 7.1.26 erfc polynomial coefficients (|abs err| <= 1.5e-7).
_AS_P = 0.3275911
_AS_A1 = 0.254829592
_AS_A2 = -0.284496736
_AS_A3 = 1.421413741
_AS_A4 = -1.453152027
_AS_A5 = 1.061405429


def skew_normal_nll_kernel(x_dim, w_ref, d_ref,
                           w1_ref, b1_ref, w2_ref, b2_ref, w3_ref, b3_ref,
                           out_ref):
    """Feature-major fused MLP + skew-normal NLL (exact log-cdf branch).

    Shapes (tm = T tile on the lane axis):
      w_ref  [2*total, tm], d_ref [x_dim, tm]
      w1_ref [3n, 2*total], w2_ref [H2, 3n], w3_ref [3*x_dim, H2]
      b*_ref [*, 1]          out_ref [2, tm]  (row0 = loss mean, row1 = min z)
    """
    # --- fused decode: one 3-matmul chain, block-diagonal (mu|sig|alpha) ------
    h1 = jnp.tanh(jnp.dot(w1_ref[...], w_ref[...],
                          preferred_element_type=jnp.float32) + b1_ref[...])
    h2 = jnp.tanh(jnp.dot(w2_ref[...], h1,
                          preferred_element_type=jnp.float32) + b2_ref[...])
    h3 = jnp.dot(w3_ref[...], h2,
                 preferred_element_type=jnp.float32) + b3_ref[...]

    mu = h3[:x_dim, :]                      # [X, tm]
    sp_in = h3[x_dim:2 * x_dim, :]          # [X, tm]
    alpha = h3[2 * x_dim:3 * x_dim, :]      # [X, tm]

    # sigma = 10 * softplus(.)  (numerically stable, log1p form)
    sig = 10.0 * (jnp.maximum(sp_in, 0.0) + jnp.log1p(jnp.exp(-jnp.abs(sp_in))))

    data = d_ref[...]
    diff = data - mu
    inv_sig = 1.0 / sig
    r = diff * inv_sig
    z = alpha * r
    base = 0.5 * r * r + jnp.log(sig)

    # exact branch of torch _norm_logcdf: log(Phi(z)).
    # Complement (erfc) form for z < 0 avoids fp32 cancellation of 1 + erf:
    #   z < 0 : Phi(z) = 0.5 * poly(t) * exp(-x^2)   -> log = log(0.5*poly) - x^2
    #   z >= 0: Phi(z) = 1 - 0.5 * poly(t) * exp(-x^2)
    x = jnp.abs(z) * _INV_SQRT2
    t = 1.0 / (1.0 + _AS_P * x)
    poly = ((((_AS_A5 * t + _AS_A4) * t + _AS_A3) * t + _AS_A2) * t + _AS_A1) * t
    ex = jnp.exp(-x * x)
    neg = z < 0.0
    arg = jnp.where(neg, 0.5 * poly, 1.0 - 0.5 * poly * ex)
    off = jnp.where(neg, -x * x, 0.0)
    log_phi = jnp.log(arg) + off

    losses = base - log_phi                                    # [X, tm]

    # lane-dense stores: one output block, two full-width rows.
    out_ref[0:1, :] = jnp.sum(losses, axis=0, keepdims=True) * (1.0 / x_dim)
    out_ref[1:2, :] = jnp.min(z, axis=0, keepdims=True)


def _losses_approx(wT, dataT, fused, x_dim):
    """torch's approx _norm_logcdf path (taken iff any z < -7). Plain XLA;
    only executed under lax.cond in that rare case."""
    h1 = jnp.tanh(fused["W1T"] @ wT + fused["b1T"])
    h2 = jnp.tanh(fused["W2T"] @ h1 + fused["b2T"])
    h3 = fused["W3T"] @ h2 + fused["b3T"]
    mu = h3[:x_dim]
    sig = 10.0 * jax.nn.softplus(h3[x_dim:2 * x_dim])
    alpha = h3[2 * x_dim:3 * x_dim]
    diff = dataT - mu
    z = alpha * diff / sig
    base = diff ** 2 / (2.0 * sig ** 2) + jnp.log(sig)
    lower = (-0.5 * z ** 2 - 4.8
             + 2509.0 * (z - 13.0) / ((z - 40.0) ** 2 * (z - 5.0)))
    upper = -0.5 * jnp.exp(-2.0 * z) - 0.2 * jnp.exp(-(z - 0.2) ** 2)
    log_phi = jnp.where(z < -0.1, lower, upper)
    return jnp.mean(base - log_phi, axis=0)                    # [T]


@functools.partial(jax.jit, static_argnames=("x_dim", "block_t"))
def skew_normal_nll_forward(w, data, fused, *, x_dim, block_t=512):
    """Forward pass. `fused` must come from fuse_params() (built once)."""
    T, in_dim = w.shape
    wT = jnp.asarray(w, jnp.float32).T          # [2*total, T]
    dataT = jnp.asarray(data, jnp.float32).T    # [x_dim, T]

    # Tile T on the LANE axis: tm must be a multiple of 128 (or the full T).
    # Prefer >=2 grid steps so the "parallel" axis shards across v7x's 2 TCs.
    if T <= 128:
        tm = T
    else:
        bt = max(128, (block_t // 128) * 128)
        half = (((T + 1) // 2) + 127) // 128 * 128
        tm = min(bt, half)
    grid = (pl.cdiv(T, tm),)

    def stream_spec(rows):                       # tiled over T (lane axis)
        return pl.BlockSpec((rows, tm), lambda i: (0, i))

    def resident_spec(arr):                      # whole array, VMEM-resident
        return pl.BlockSpec(arr.shape, lambda i: (0, 0))

    kernel = functools.partial(skew_normal_nll_kernel, x_dim)
    out = pl.pallas_call(
        kernel,
        out_shape=jax.ShapeDtypeStruct((2, T), jnp.float32),
        grid_spec=pltpu.PrefetchScalarGridSpec(
            num_scalar_prefetch=0,
            grid=grid,
            in_specs=[stream_spec(in_dim), stream_spec(x_dim),
                      resident_spec(fused["W1T"]), resident_spec(fused["b1T"]),
                      resident_spec(fused["W2T"]), resident_spec(fused["b2T"]),
                      resident_spec(fused["W3T"]), resident_spec(fused["b3T"])],
            out_specs=pl.BlockSpec((2, tm), lambda i: (0, i)),
        ),
        compiler_params=pltpu.CompilerParams(
            dimension_semantics=("parallel",)),
    )(wT, dataT, fused["W1T"], fused["b1T"], fused["W2T"], fused["b2T"],
      fused["W3T"], fused["b3T"])

    avg_exact = out[0, :]
    zmin = out[1, :]

    # torch's _norm_logcdf switches branch for the WHOLE tensor iff any
    # z-score < -7; the rare approx path is evaluated lazily in plain XLA.
    use_approx = jnp.any(zmin < -7.0)
    return jax.lax.cond(
        use_approx,
        lambda: _losses_approx(wT, dataT, fused, x_dim),
        lambda: avg_exact,
    )


# ----------------------------- parameter helpers -----------------------------

def _init_linear(key, fan_in, fan_out):
    """PyTorch nn.Linear default init; weight stored as [in, out]."""
    kw, kb = jax.random.split(key)
    bound = 1.0 / math.sqrt(float(fan_in))
    w = jax.random.uniform(kw, (fan_in, fan_out), jnp.float32, -bound, bound)
    b = jax.random.uniform(kb, (1, fan_out), jnp.float32, -bound, bound)
    return w, b


def make_params(key, x_dim, num_freqs, n):
    f0, f1, f2 = num_freqs
    keys = jax.random.split(key, 9)
    p = {}
    p["w1_mu"], p["b1_mu"] = _init_linear(keys[0], 2 * f0, n)
    p["w2_mu"], p["b2_mu"] = _init_linear(keys[1], n, 64)
    p["w3_mu"], p["b3_mu"] = _init_linear(keys[2], 64, x_dim)
    p["w1_sig"], p["b1_sig"] = _init_linear(keys[3], 2 * f1, n)
    p["w2_sig"], p["b2_sig"] = _init_linear(keys[4], n, 64)
    p["w3_sig"], p["b3_sig"] = _init_linear(keys[5], 64, x_dim)
    p["w1_a"], p["b1_a"] = _init_linear(keys[6], 2 * f2, n)
    p["w2_a"], p["b2_a"] = _init_linear(keys[7], n, 32)
    p["w3_a"], p["b3_a"] = _init_linear(keys[8], 32, x_dim)
    return p


def fuse_params(params, num_freqs, x_dim):
    """One-time fusion: block-diagonal (mu|sig|alpha) weights, with the
    param_idxs column gather folded into a row permutation of W1; stored
    transposed (feature-major) for the kernel. Call ONCE at init time."""
    f0, f1, f2 = num_freqs
    total = f0 + f1 + f2
    n = params["w1_mu"].shape[1]
    h_mu = params["w2_mu"].shape[1]
    h_sig = params["w2_sig"].shape[1]
    h_a = params["w2_a"].shape[1]
    H2 = h_mu + h_sig + h_a

    idx_mu = np.concatenate([np.arange(f0), total + np.arange(f0)])
    idx_sig = np.concatenate([f0 + np.arange(f1), total + f0 + np.arange(f1)])
    idx_a = np.concatenate([f0 + f1 + np.arange(f2),
                            total + f0 + f1 + np.arange(f2)])

    W1 = np.zeros((2 * total, 3 * n), np.float32)
    W1[idx_mu, 0:n] = np.asarray(params["w1_mu"])
    W1[idx_sig, n:2 * n] = np.asarray(params["w1_sig"])
    W1[idx_a, 2 * n:3 * n] = np.asarray(params["w1_a"])
    b1 = np.concatenate([np.asarray(params["b1_mu"]),
                         np.asarray(params["b1_sig"]),
                         np.asarray(params["b1_a"])], axis=-1)

    W2 = np.zeros((3 * n, H2), np.float32)
    W2[0:n, 0:h_mu] = np.asarray(params["w2_mu"])
    W2[n:2 * n, h_mu:h_mu + h_sig] = np.asarray(params["w2_sig"])
    W2[2 * n:3 * n, h_mu + h_sig:H2] = np.asarray(params["w2_a"])
    b2 = np.concatenate([np.asarray(params["b2_mu"]),
                         np.asarray(params["b2_sig"]),
                         np.asarray(params["b2_a"])], axis=-1)

    W3 = np.zeros((H2, 3 * x_dim), np.float32)
    W3[0:h_mu, 0:x_dim] = np.asarray(params["w3_mu"])
    W3[h_mu:h_mu + h_sig, x_dim:2 * x_dim] = np.asarray(params["w3_sig"])
    W3[h_mu + h_sig:H2, 2 * x_dim:3 * x_dim] = np.asarray(params["w3_a"])
    b3 = np.concatenate([np.asarray(params["b3_mu"]),
                         np.asarray(params["b3_sig"]),
                         np.asarray(params["b3_a"])], axis=-1)

    return {
        "W1T": jnp.asarray(W1.T), "b1T": jnp.asarray(b1.T),
        "W2T": jnp.asarray(W2.T), "b2T": jnp.asarray(b2.T),
        "W3T": jnp.asarray(W3.T), "b3T": jnp.asarray(b3.T),
    }


def _reference_forward(w, data, fused, x_dim):
    """Pure-JAX reference of the torch forward (for validation)."""
    wT = jnp.asarray(w, jnp.float32).T
    dataT = jnp.asarray(data, jnp.float32).T
    h1 = jnp.tanh(fused["W1T"] @ wT + fused["b1T"])
    h2 = jnp.tanh(fused["W2T"] @ h1 + fused["b2T"])
    h3 = fused["W3T"] @ h2 + fused["b3T"]
    mu = h3[:x_dim]
    sig = 10.0 * jax.nn.softplus(h3[x_dim:2 * x_dim])
    alpha = h3[2 * x_dim:3 * x_dim]
    diff = dataT - mu
    z = alpha * diff / sig
    base = diff ** 2 / (2.0 * sig ** 2) + jnp.log(sig)
    exact = base - jax.scipy.stats.norm.logcdf(z)
    lower = (-0.5 * z ** 2 - 4.8
             + 2509.0 * (z - 13.0) / ((z - 40.0) ** 2 * (z - 5.0)))
    upper = -0.5 * jnp.exp(-2.0 * z) - 0.2 * jnp.exp(-(z - 0.2) ** 2)
    approx = base - jnp.where(z < -0.1, lower, upper)
    losses = jnp.where(jnp.any(z < -7.0), approx, exact)
    return jnp.mean(losses, axis=0)


if __name__ == "__main__":
    num_freqs = (4, 4, 4)
    n = 32
    x_dim = 16

    key = jax.random.PRNGKey(0)
    k_w, k_d, k_p, k_w2, k_d2 = jax.random.split(key, 5)
    params = make_params(k_p, x_dim, num_freqs, n)
    fused = fuse_params(params, num_freqs, x_dim)     # one-time weight fusion

    # small case: single block (T = 8 snapshots)
    T = 8
    w = jax.random.normal(k_w, (T, 2 * sum(num_freqs)), jnp.float32)
    data = jax.random.normal(k_d, (T, x_dim), jnp.float32)
    avg_nll = skew_normal_nll_forward(w, data, fused, x_dim=x_dim)
    jax.block_until_ready(avg_nll)
    assert avg_nll.shape == (T,)
    assert bool(jnp.all(jnp.isfinite(avg_nll)))
    ref = _reference_forward(w, data, fused, x_dim)
    assert bool(jnp.allclose(avg_nll, ref, rtol=1e-3, atol=1e-3))

    # larger case: exercises the tiled / multi-step parallel grid (v7x split)
    T2 = 512
    w2 = jax.random.normal(k_w2, (T2, 2 * sum(num_freqs)), jnp.float32)
    data2 = jax.random.normal(k_d2, (T2, x_dim), jnp.float32)
    avg_nll2 = skew_normal_nll_forward(w2, data2, fused, x_dim=x_dim)
    jax.block_until_ready(avg_nll2)
    assert avg_nll2.shape == (T2,)
    assert bool(jnp.all(jnp.isfinite(avg_nll2)))
    ref2 = _reference_forward(w2, data2, fused, x_dim)
    assert bool(jnp.allclose(avg_nll2, ref2, rtol=1e-3, atol=1e-3))

    print("KERNEL_OK")
</pallas_src>

<mosaic_0001>
module attributes {stable_mosaic.version = 11 : i64} {
  func.func @skew_normal_nll_kernel(%arg0: i32, %arg1: memref<24x8xf32, #tpu.memory_space<vmem>>, %arg2: memref<16x8xf32, #tpu.memory_space<vmem>>, %arg3: memref<96x24xf32, #tpu.memory_space<vmem>>, %arg4: memref<96x1xf32, #tpu.memory_space<vmem>>, %arg5: memref<160x96xf32, #tpu.memory_space<vmem>>, %arg6: memref<160x1xf32, #tpu.memory_space<vmem>>, %arg7: memref<48x160xf32, #tpu.memory_space<vmem>>, %arg8: memref<48x1xf32, #tpu.memory_space<vmem>>, %arg9: memref<2x8xf32, #tpu.memory_space<vmem>>) attributes {dimension_semantics = [#tpu.dimension_semantics<parallel>], iteration_bounds = array<i64: 1>, scalar_prefetch = 0 : i64, scratch_operands = 0 : i64, tpu.core_type = #tpu.core_type<tc>, window_params = [{transform_indices = @transform_0, window_bounds = array<i64: 24, 8>}, {transform_indices = @transform_1, window_bounds = array<i64: 16, 8>}, {pipeline_mode = #tpu.pipeline_mode<synchronous>, transform_indices = @transform_2, window_bounds = array<i64: 96, 24>}, {pipeline_mode = #tpu.pipeline_mode<synchronous>, transform_indices = @transform_3, window_bounds = array<i64: 96, 1>}, {pipeline_mode = #tpu.pipeline_mode<synchronous>, transform_indices = @transform_4, window_bounds = array<i64: 160, 96>}, {pipeline_mode = #tpu.pipeline_mode<synchronous>, transform_indices = @transform_5, window_bounds = array<i64: 160, 1>}, {pipeline_mode = #tpu.pipeline_mode<synchronous>, transform_indices = @transform_6, window_bounds = array<i64: 48, 160>}, {pipeline_mode = #tpu.pipeline_mode<synchronous>, transform_indices = @transform_7, window_bounds = array<i64: 48, 1>}, {transform_indices = @transform_8, window_bounds = array<i64: 2, 8>}]} {
    %c0 = arith.constant 0 : index
    %c0_0 = arith.constant 0 : index
    %0 = vector.load %arg3[%c0, %c0_0] : memref<96x24xf32, #tpu.memory_space<vmem>>, vector<96x24xf32>
    %c0_1 = arith.constant 0 : index
    %c0_2 = arith.constant 0 : index
    %1 = vector.load %arg1[%c0_1, %c0_2] : memref<24x8xf32, #tpu.memory_space<vmem>>, vector<24x8xf32>
    %cst = arith.constant dense<0.000000e+00> : vector<96x8xf32>
    %2 = tpu.matmul %0, %1, %cst {dimension_numbers = #tpu.dot_dimension_numbers<[1], [0], [0], [1], [0, 0, 1, 1], [], []>} : vector<96x24xf32>, vector<24x8xf32>, vector<96x8xf32> -> vector<96x8xf32>
    %c0_3 = arith.constant 0 : index
    %c0_4 = arith.constant 0 : index
    %3 = vector.load %arg4[%c0_3, %c0_4] : memref<96x1xf32, #tpu.memory_space<vmem>>, vector<96x1xf32>
    %4 = vector.broadcast %3 : vector<96x1xf32> to vector<96x8xf32>
    %5 = arith.addf %2, %4 : vector<96x8xf32>
    %6 = math.tanh %5 : vector<96x8xf32>
    %c0_5 = arith.constant 0 : index
    %c0_6 = arith.constant 0 : index
    %7 = vector.load %arg5[%c0_5, %c0_6] : memref<160x96xf32, #tpu.memory_space<vmem>>, vector<160x96xf32>
    %cst_7 = arith.constant dense<0.000000e+00> : vector<160x8xf32>
    %8 = tpu.matmul %7, %6, %cst_7 {dimension_numbers = #tpu.dot_dimension_numbers<[1], [0], [0], [1], [0, 0, 1, 1], [], []>} : vector<160x96xf32>, vector<96x8xf32>, vector<160x8xf32> -> vector<160x8xf32>
    %c0_8 = arith.constant 0 : index
    %c0_9 = arith.constant 0 : index
    %9 = vector.load %arg6[%c0_8, %c0_9] : memref<160x1xf32, #tpu.memory_space<vmem>>, vector<160x1xf32>
    %10 = vector.broadcast %9 : vector<160x1xf32> to vector<160x8xf32>
    %11 = arith.addf %8, %10 : vector<160x8xf32>
    %12 = math.tanh %11 : vector<160x8xf32>
    %c0_10 = arith.constant 0 : index
    %c0_11 = arith.constant 0 : index
    %13 = vector.load %arg7[%c0_10, %c0_11] : memref<48x160xf32, #tpu.memory_space<vmem>>, vector<48x160xf32>
    %cst_12 = arith.constant dense<0.000000e+00> : vector<48x8xf32>
    %14 = tpu.matmul %13, %12, %cst_12 {dimension_numbers = #tpu.dot_dimension_numbers<[1], [0], [0], [1], [0, 0, 1, 1], [], []>} : vector<48x160xf32>, vector<160x8xf32>, vector<48x8xf32> -> vector<48x8xf32>
    %c0_13 = arith.constant 0 : index
    %c0_14 = arith.constant 0 : index
    %15 = vector.load %arg8[%c0_13, %c0_14] : memref<48x1xf32, #tpu.memory_space<vmem>>, vector<48x1xf32>
    %16 = vector.broadcast %15 : vector<48x1xf32> to vector<48x8xf32>
    %17 = arith.addf %14, %16 : vector<48x8xf32>
    %18 = vector.extract_strided_slice %17 {offsets = [0, 0], sizes = [16, 8], strides = [1, 1]} : vector<48x8xf32> to vector<16x8xf32>
    %19 = vector.extract_strided_slice %17 {offsets = [16, 0], sizes = [16, 8], strides = [1, 1]} : vector<48x8xf32> to vector<16x8xf32>
    %20 = vector.extract_strided_slice %17 {offsets = [32, 0], sizes = [16, 8], strides = [1, 1]} : vector<48x8xf32> to vector<16x8xf32>
    %cst_15 = arith.constant 0.000000e+00 : f32
    %21 = vector.broadcast %cst_15 : f32 to vector<16x8xf32>
    %22 = arith.maximumf %19, %21 : vector<16x8xf32>
    %23 = math.absf %19 : vector<16x8xf32>
    %cst_16 = arith.constant 0.000000e+00 : f32
    %24 = vector.broadcast %cst_16 : f32 to vector<16x8xf32>
    %25 = arith.subf %24, %23 : vector<16x8xf32>
    %26 = math.exp %25 : vector<16x8xf32>
    %27 = math.log1p %26 : vector<16x8xf32>
    %28 = arith.addf %22, %27 : vector<16x8xf32>
    %cst_17 = arith.constant 1.000000e+01 : f32
    %29 = vector.broadcast %cst_17 : f32 to vector<16x8xf32>
    %30 = arith.mulf %29, %28 : vector<16x8xf32>
    %c0_18 = arith.constant 0 : index
    %c0_19 = arith.constant 0 : index
    %31 = vector.load %arg2[%c0_18, %c0_19] : memref<16x8xf32, #tpu.memory_space<vmem>>, vector<16x8xf32>
    %32 = arith.subf %31, %18 : vector<16x8xf32>
    %cst_20 = arith.constant 1.000000e+00 : f32
    %33 = vector.broadcast %cst_20 : f32 to vector<16x8xf32>
    %34 = arith.divf %33, %30 : vector<16x8xf32>
    %35 = arith.mulf %32, %34 : vector<16x8xf32>
    %36 = arith.mulf %20, %35 : vector<16x8xf32>
    %cst_21 = arith.constant 5.000000e-01 : f32
    %37 = vector.broadcast %cst_21 : f32 to vector<16x8xf32>
    %38 = arith.mulf %37, %35 : vector<16x8xf32>
    %39 = arith.mulf %38, %35 : vector<16x8xf32>
    %40 = math.log %30 : vector<16x8xf32>
    %41 = arith.addf %39, %40 : vector<16x8xf32>
    %42 = math.absf %36 : vector<16x8xf32>
    %cst_22 = arith.constant 0.707106769 : f32
    %43 = vector.broadcast %cst_22 : f32 to vector<16x8xf32>
    %44 = arith.mulf %42, %43 : vector<16x8xf32>
    %cst_23 = arith.constant 0.327591091 : f32
    %45 = vector.broadcast %cst_23 : f32 to vector<16x8xf32>
    %46 = arith.mulf %45, %44 : vector<16x8xf32>
    %cst_24 = arith.constant 1.000000e+00 : f32
    %47 = vector.broadcast %cst_24 : f32 to vector<16x8xf32>
    %48 = arith.addf %47, %46 : vector<16x8xf32>
    %cst_25 = arith.constant 1.000000e+00 : f32
    %49 = vector.broadcast %cst_25 : f32 to vector<16x8xf32>
    %50 = arith.divf %49, %48 : vector<16x8xf32>
    %cst_26 = arith.constant 1.06140542 : f32
    %51 = vector.broadcast %cst_26 : f32 to vector<16x8xf32>
    %52 = arith.mulf %51, %50 : vector<16x8xf32>
    %cst_27 = arith.constant -1.45315206 : f32
    %53 = vector.broadcast %cst_27 : f32 to vector<16x8xf32>
    %54 = arith.addf %52, %53 : vector<16x8xf32>
    %55 = arith.mulf %54, %50 : vector<16x8xf32>
    %cst_28 = arith.constant 1.42141378 : f32
    %56 = vector.broadcast %cst_28 : f32 to vector<16x8xf32>
    %57 = arith.addf %55, %56 : vector<16x8xf32>
    %58 = arith.mulf %57, %50 : vector<16x8xf32>
    %cst_29 = arith.constant -0.284496725 : f32
    %59 = vector.broadcast %cst_29 : f32 to vector<16x8xf32>
    %60 = arith.addf %58, %59 : vector<16x8xf32>
    %61 = arith.mulf %60, %50 : vector<16x8xf32>
    %cst_30 = arith.constant 0.254829586 : f32
    %62 = vector.broadcast %cst_30 : f32 to vector<16x8xf32>
    %63 = arith.addf %61, %62 : vector<16x8xf32>
    %64 = arith.mulf %63, %50 : vector<16x8xf32>
    %cst_31 = arith.constant 0.000000e+00 : f32
    %65 = vector.broadcast %cst_31 : f32 to vector<16x8xf32>
    %66 = arith.subf %65, %44 : vector<16x8xf32>
    %67 = arith.mulf %66, %44 : vector<16x8xf32>
    %68 = math.exp %67 : vector<16x8xf32>
    %cst_32 = arith.constant 0.000000e+00 : f32
    %69 = vector.broadcast %cst_32 : f32 to vector<16x8xf32>
    %70 = arith.cmpf olt, %36, %69 : vector<16x8xf32>
    %cst_33 = arith.constant 5.000000e-01 : f32
    %71 = vector.broadcast %cst_33 : f32 to vector<16x8xf32>
    %72 = arith.mulf %71, %64 : vector<16x8xf32>
    %cst_34 = arith.constant 5.000000e-01 : f32
    %73 = vector.broadcast %cst_34 : f32 to vector<16x8xf32>
    %74 = arith.mulf %73, %64 : vector<16x8xf32>
    %75 = arith.mulf %74, %68 : vector<16x8xf32>
    %cst_35 = arith.constant 1.000000e+00 : f32
    %76 = vector.broadcast %cst_35 : f32 to vector<16x8xf32>
    %77 = arith.subf %76, %75 : vector<16x8xf32>
    %78 = arith.select %70, %72, %77 : vector<16x8xi1>, vector<16x8xf32>
    %cst_36 = arith.constant 0.000000e+00 : f32
    %79 = vector.broadcast %cst_36 : f32 to vector<16x8xf32>
    %80 = arith.subf %79, %44 : vector<16x8xf32>
    %81 = arith.mulf %80, %44 : vector<16x8xf32>
    %cst_37 = arith.constant 0.000000e+00 : f32
    %82 = vector.broadcast %cst_37 : f32 to vector<16x8xf32>
    %83 = arith.select %70, %81, %82 : vector<16x8xi1>, vector<16x8xf32>
    %84 = math.log %78 : vector<16x8xf32>
    %85 = arith.addf %84, %83 : vector<16x8xf32>
    %86 = arith.subf %41, %85 : vector<16x8xf32>
    %cst_38 = arith.constant dense<0.000000e+00> : vector<8xf32>
    %87 = vector.multi_reduction <add>, %86, %cst_38 [0] : vector<16x8xf32> to vector<8xf32>
    %88 = vector.shape_cast %87 : vector<8xf32> to vector<1x8xf32>
    %cst_39 = arith.constant 6.250000e-02 : f32
    %89 = vector.broadcast %cst_39 : f32 to vector<1x8xf32>
    %90 = arith.mulf %88, %89 : vector<1x8xf32>
    %c0_40 = arith.constant 0 : index
    %c0_41 = arith.constant 0 : index
    %91 = vector.load %arg9[%c0_40, %c0_41] : memref<2x8xf32, #tpu.memory_space<vmem>>, vector<1x8xf32>
    tpu.vector_store %arg9[%c0_40, %c0_41], %90 {strides = array<i32>} : memref<2x8xf32, #tpu.memory_space<vmem>>, vector<1x8xf32>,
    %cst_42 = arith.constant dense<0x7F800000> : vector<8xf32>
    %92 = vector.multi_reduction <minimumf>, %36, %cst_42 [0] : vector<16x8xf32> to vector<8xf32>
    %93 = vector.shape_cast %92 : vector<8xf32> to vector<1x8xf32>
    %c1 = arith.constant 1 : index
    %c0_43 = arith.constant 0 : index
    %94 = vector.load %arg9[%c1, %c0_43] : memref<2x8xf32, #tpu.memory_space<vmem>>, vector<1x8xf32>
    tpu.vector_store %arg9[%c1, %c0_43], %93 {strides = array<i32>} : memref<2x8xf32, #tpu.memory_space<vmem>>, vector<1x8xf32>,
    return
  }
  func.func @transform_0(%arg0: i32) -> (i32, i32) {
    %c0_i32 = arith.constant 0 : i32
    %c0_i32_0 = arith.constant 0 : i32
    return %c0_i32, %arg0 : i32, i32
  }
  func.func @transform_1(%arg0: i32) -> (i32, i32) {
    %c0_i32 = arith.constant 0 : i32
    %c0_i32_0 = arith.constant 0 : i32
    return %c0_i32, %arg0 : i32, i32
  }
  func.func @transform_2(%arg0: i32) -> (i32, i32) {
    %c0_i32 = arith.constant 0 : i32
    %c0_i32_0 = arith.constant 0 : i32
    %c0_i32_1 = arith.constant 0 : i32
    return %c0_i32, %c0_i32_0 : i32, i32
  }
  func.func @transform_3(%arg0: i32) -> (i32, i32) {
    %c0_i32 = arith.constant 0 : i32
    %c0_i32_0 = arith.constant 0 : i32
    %c0_i32_1 = arith.constant 0 : i32
    return %c0_i32, %c0_i32_0 : i32, i32
  }
  func.func @transform_4(%arg0: i32) -> (i32, i32) {
    %c0_i32 = arith.constant 0 : i32
    %c0_i32_0 = arith.constant 0 : i32
    %c0_i32_1 = arith.constant 0 : i32
    return %c0_i32, %c0_i32_0 : i32, i32
  }
  func.func @transform_5(%arg0: i32) -> (i32, i32) {
    %c0_i32 = arith.constant 0 : i32
    %c0_i32_0 = arith.constant 0 : i32
    %c0_i32_1 = arith.constant 0 : i32
    return %c0_i32, %c0_i32_0 : i32, i32
  }
  func.func @transform_6(%arg0: i32) -> (i32, i32) {
    %c0_i32 = arith.constant 0 : i32
    %c0_i32_0 = arith.constant 0 : i32
    %c0_i32_1 = arith.constant 0 : i32
    return %c0_i32, %c0_i32_0 : i32, i32
  }
  func.func @transform_7(%arg0: i32) -> (i32, i32) {
    %c0_i32 = arith.constant 0 : i32
    %c0_i32_0 = arith.constant 0 : i32
    %c0_i32_1 = arith.constant 0 : i32
    return %c0_i32, %c0_i32_0 : i32, i32
  }
  func.func @transform_8(%arg0: i32) -> (i32, i32) {
    %c0_i32 = arith.constant 0 : i32
    %c0_i32_0 = arith.constant 0 : i32
    return %c0_i32, %arg0 : i32, i32
  }
}

</mosaic_0001>

<bundles_post_ra>
// kernel: skew_normal_nll_forward.1
= control target key start
LH: loop header
LB: loop body
LE: loop exit
PB: predicated region body
PF: predicated region fallthrough
CT: control target
= control target key end

     0   :  { %vm116_vm0 = vcmask 195584   ;;  %v1294_v2 = vmov 0   ;;  %vm430_vm1 = vcmask 785408   ;;  %vm724_vm2 = vcmask 261120   ;;  %s1678_s0 = inlined_call_operand.vmem [shape: f32[24,8], index: 0, kind: input, shape index: {}]   ;;  %s1679_s2 = inlined_call_operand.vmem [shape: f32[96,24], index: 2, kind: input, shape index: {}]   ;;  %s1680_s3 = inlined_call_operand.vmem [shape: f32[96,1], index: 3, kind: input, shape index: {}]   ;;  %s1681_s5 = inlined_call_operand.vmem [shape: f32[160,1], index: 5, kind: input, shape index: {}]   ;;  %s1682_s7 = inlined_call_operand.vmem [shape: f32[48,1], index: 7, kind: input, shape index: {}]   ;;  %s1683_s4 = inlined_call_operand.vmem [shape: f32[160,96], index: 4, kind: input, shape index: {}]   ;;  %s1684_s6 = inlined_call_operand.vmem [shape: f32[48,160], index: 6, kind: input, shape index: {}]   ;;  %s1685_s1 = inlined_call_operand.vmem [shape: f32[16,8], index: 1, kind: input, shape index: {}]   ;;  %s1686_s8 = inlined_call_operand.vmem [shape: f32[2,8], index: 8, kind: output, shape index: {}]  }
   0x1   :  { %v41_v0 = vld [vmem:[%s1678_s0] sm:$0xff]  ;;  %v42_v1 = vld [vmem:[%s1678_s0 + $0x8] sm:$0xff]  ;;  %1200 = vset.pattern.permute.xlu0 %v1294_v2  ;;  %1201 = vset.pattern.permute.xlu1 %v1294_v2  ;;  %v43_v5 = vld [vmem:[%s1678_s0 + $0x10] sm:$0xff]  ;;  %vm950_vm5 = vcmask 64512   ;;  %vm961_vm6 = vcmask 57344  }
   0x2   :  { %v1140_v3 = vpack.c.bf16 %v42_v1, %v41_v0  ;;  %v29_v4 = vld [vmem:[%s1679_s2] sm:$0xff]  ;;  %v46_v7 = vld [vmem:[%s1680_s3 + $0x10] sm:$0xff]  ;;  %v45_v8 = vld [vmem:[%s1680_s3 + $0x8] sm:$0xff] }
   0x3   :  { %1068 = vmatprep.mubr.msk.f32.mxu0 %vm116_vm0, %v29_v4  ;;  %v44_v6 = vld [vmem:[%s1680_s3] sm:$0xff]  ;;  %68 = vperm.xlu1 %1201, %v46_v7   ;;  %v30_v9 = vld [vmem:[%s1679_s2 + $0x8] sm:$0xff]  ;;  %v47_v10 = vld [vmem:[%s1680_s3 + $0x18] sm:$0xff] }
   0x4   :  { %1141 = vmatprep.subr.bf16.mxu0 %v1140_v3  ;;  %58 = vperm.xlu0 %1200, %v44_v6   ;;  %v31_v11 = vld [vmem:[%s1679_s2 + $0x10] sm:$0xff]  ;;  %v48_v12 = vld [vmem:[%s1680_s3 + $0x20] sm:$0xff]  ;;  %v32_v13 = vld [vmem:[%s1679_s2 + $0x18] sm:$0xff] }
   0x5   :  { %1143 = vmatpush3.bf16.msra.mxu0 %v1140_v3  ;;  %v49_v14 = vld [vmem:[%s1680_s3 + $0x28] sm:$0xff]  ;;  %v33_v15 = vld [vmem:[%s1679_s2 + $0x20] sm:$0xff]  ;;  %v50_v16 = vld [vmem:[%s1680_s3 + $0x30] sm:$0xff] }
   0x6   :  { %1066 = vmatprep.subr.mxu0 %v43_v5  ;;  %v34_v17 = vld [vmem:[%s1679_s2 + $0x28] sm:$0xff]  ;;  %v51_v18 = vld [vmem:[%s1680_s3 + $0x38] sm:$0xff]  ;;  %v35_v19 = vld [vmem:[%s1679_s2 + $0x30] sm:$0xff] }
   0x7   :  { %73 = vperm.xlu1 %1201, %v47_v10   ;;  %v52_v20 = vld [vmem:[%s1680_s3 + $0x40] sm:$0xff]  ;;  %v36_v21 = vld [vmem:[%s1679_s2 + $0x38] sm:$0xff]  ;;  %v53_v22 = vld [vmem:[%s1680_s3 + $0x48] sm:$0xff] }
   0x8   :  { %63 = vperm.xlu0 %1200, %v45_v8   ;;  %v37_v23 = vld [vmem:[%s1679_s2 + $0x40] sm:$0xff]  ;;  %v54_v24 = vld [vmem:[%s1680_s3 + $0x50] sm:$0xff]  ;;  %v38_v25 = vld [vmem:[%s1679_s2 + $0x48] sm:$0xff] }
   0x9   :  { %1067 = vmatpush3.msra.mxu0 %v43_v5  ;;  %v55_v26 = vld [vmem:[%s1680_s3 + $0x58] sm:$0xff]  ;;  %v39_v27 = vld [vmem:[%s1679_s2 + $0x50] sm:$0xff]  ;;  %v310_v28 = vld [vmem:[%s1681_s5] sm:$0xff] }
   0xa   :  { %1069 = vmatmul.mubr.msk.f32.vlgmr.msra.gmra.mrb[0].mxu0 %vm116_vm0, %v30_v9  ;;  %v40_v29 = vld [vmem:[%s1679_s2 + $0x58] sm:$0xff]  ;;  %v311_v30 = vld [vmem:[%s1681_s5 + $0x8] sm:$0xff]  ;;  %v312_v31 = vld [vmem:[%s1681_s5 + $0x10] sm:$0xff] }
   0xb   :  { %1071 = vmatprep.mubr.msk.f32.mxu0 %vm116_vm0, %v31_v11  ;;  %83 = vperm.xlu1 %1201, %v49_v14   ;;  %v313_v32 = vld [vmem:[%s1681_s5 + $0x18] sm:$0xff]  ;;  %v314_v33 = vld [vmem:[%s1681_s5 + $0x20] sm:$0xff]  ;;  %v315_v34 = vld [vmem:[%s1681_s5 + $0x28] sm:$0xff] }
   0xc   :  { %78 = vperm.xlu0 %1200, %v48_v12   ;;  %v316_v35 = vld [vmem:[%s1681_s5 + $0x30] sm:$0xff]  ;;  %v317_v36 = vld [vmem:[%s1681_s5 + $0x38] sm:$0xff]  ;;  %v318_v37 = vld [vmem:[%s1681_s5 + $0x40] sm:$0xff] }
   0xd   :  { %v319_v38 = vld [vmem:[%s1681_s5 + $0x48] sm:$0xff]  ;;  %v320_v39 = vld [vmem:[%s1681_s5 + $0x50] sm:$0xff]  ;;  %v321_v40 = vld [vmem:[%s1681_s5 + $0x58] sm:$0xff] }
   0xe   :  { %1072 = vmatmul.mubr.msk.f32.gmra.mrb[2].mxu0 %vm116_vm0, %v32_v13  ;;  %v322_v41 = vld [vmem:[%s1681_s5 + $0x60] sm:$0xff]  ;;  %v323_v42 = vld [vmem:[%s1681_s5 + $0x68] sm:$0xff]  ;;  %v324_v43 = vld [vmem:[%s1681_s5 + $0x70] sm:$0xff] }
   0xf   :  { %1074 = vmatprep.mubr.msk.f32.mxu0 %vm116_vm0, %v33_v15  ;;  %93 = vperm.xlu1 %1201, %v51_v18   ;;  %v325_v44 = vld [vmem:[%s1681_s5 + $0x78] sm:$0xff]  ;;  %v326_v45 = vld [vmem:[%s1681_s5 + $0x80] sm:$0xff]  ;;  %v327_v46 = vld [vmem:[%s1681_s5 + $0x88] sm:$0xff] }
  0x10   :  { %88 = vperm.xlu0 %1200, %v50_v16   ;;  %v328_v47 = vld [vmem:[%s1681_s5 + $0x90] sm:$0xff]  ;;  %v329_v48 = vld [vmem:[%s1681_s5 + $0x98] sm:$0xff]  ;;  %v688_v51 = vld [vmem:[%s1682_s7] sm:$0xff] }
  0x11   :  { %v690_v49 = vld [vmem:[%s1682_s7 + $0x10] sm:$0xff]  ;;  %v691_v50 = vld [vmem:[%s1682_s7 + $0x18] sm:$0xff]  ;;  %v689_v52 = vld [vmem:[%s1682_s7 + $0x8] sm:$0xff] }
  0x12   :  { %1075 = vmatmul.mubr.msk.f32.gmra.mrb[4].mxu0 %vm116_vm0, %v34_v17  ;;  %v692_v53 = vld [vmem:[%s1682_s7 + $0x20] sm:$0xff]  ;;  %v693_v54 = vld [vmem:[%s1682_s7 + $0x28] sm:$0xff] }
  0x13   :  { %1077 = vmatprep.mubr.msk.f32.mxu0 %vm116_vm0, %v35_v19  ;;  %103 = vperm.xlu1 %1201, %v53_v22   ;;  %v290_v55 = vld [vmem:[%s1683_s4] sm:$0xff] }
  0x14   :  { %98 = vperm.xlu0 %1200, %v52_v20   ;;  %1110 = vmatprep.mubr.msk.f32.mxu1 %vm430_vm1, %v290_v55  ;;  %v300_v55 = vld [vmem:[%s1683_s4 + $0x50] sm:$0xff] }
  0x16   :  { %1078 = vmatmul.mubr.msk.f32.gmra.mrb[6].mxu0 %vm116_vm0, %v36_v21 }
  0x17   :  { %1080 = vmatprep.mubr.msk.f32.mxu0 %vm116_vm0, %v37_v23  ;;  %113 = vperm.xlu1 %1201, %v55_v26  }
  0x18   :  { %108 = vperm.xlu0 %1200, %v54_v24  }
  0x1a   :  { %1081 = vmatmul.mubr.msk.f32.gmra.mrb[8].mxu0 %vm116_vm0, %v38_v25 }
  0x1b   :  { %1083 = vmatprep.mubr.msk.f32.mxu0 %vm116_vm0, %v39_v27  ;;  %337 = vperm.xlu1 %1201, %v311_v30  }
  0x1c   :  { %332 = vperm.xlu0 %1200, %v310_v28  }
  0x1e   :  { %1084 = vmatmul.mubr.msk.f32.gmra.mrb[10].mxu0 %vm116_vm0, %v40_v29 }
  0x1f   :  { %347 = vperm.xlu1 %1201, %v313_v32  }
  0x20   :  { %342 = vperm.xlu0 %1200, %v312_v31  }
  0x23   :  { %357 = vperm.xlu1 %1201, %v315_v34  }
  0x24   :  { %352 = vperm.xlu0 %1200, %v314_v33  }
  0x27   :  { %367 = vperm.xlu1 %1201, %v317_v36  }
  0x28   :  { %362 = vperm.xlu0 %1200, %v316_v35  }
  0x2b   :  { %377 = vperm.xlu1 %1201, %v319_v38  }
  0x2c   :  { %372 = vperm.xlu0 %1200, %v318_v37  }
  0x2f   :  { %387 = vperm.xlu1 %1201, %v321_v40  }
  0x30   :  { %382 = vperm.xlu0 %1200, %v320_v39  }
  0x33   :  { %397 = vperm.xlu1 %1201, %v323_v42  }
  0x34   :  { %392 = vperm.xlu0 %1200, %v322_v41  }
  0x37   :  { %407 = vperm.xlu1 %1201, %v325_v44  }
  0x38   :  { %402 = vperm.xlu0 %1200, %v324_v43  }
  0x3b   :  { %417 = vperm.xlu1 %1201, %v327_v46   ;;  %v291_v46 = vld [vmem:[%s1683_s4 + $0x8] sm:$0xff] }
  0x3c   :  { %412 = vperm.xlu0 %1200, %v326_v45  }
  0x3f   :  { %427 = vperm.xlu1 %1201, %v329_v48   ;;  %v293_v48 = vld [vmem:[%s1683_s4 + $0x18] sm:$0xff] }
  0x40   :  { %422 = vperm.xlu0 %1200, %v328_v47   ;;  %v292_v47 = vld [vmem:[%s1683_s4 + $0x10] sm:$0xff] }
  0x43   :  { %711 = vperm.xlu1 %1201, %v691_v50   ;;  %v295_v50 = vld [vmem:[%s1683_s4 + $0x28] sm:$0xff] }
  0x44   :  { %706 = vperm.xlu0 %1200, %v690_v49   ;;  %v294_v49 = vld [vmem:[%s1683_s4 + $0x20] sm:$0xff] }
  0x47   :  { %701 = vperm.xlu1 %1201, %v689_v52   ;;  %v297_v52 = vld [vmem:[%s1683_s4 + $0x38] sm:$0xff] }
  0x48   :  { %696 = vperm.xlu0 %1200, %v688_v51   ;;  %v296_v51 = vld [vmem:[%s1683_s4 + $0x30] sm:$0xff] }
  0x4b   :  { %721 = vperm.xlu1 %1201, %v693_v54   ;;  %v299_v54 = vld [vmem:[%s1683_s4 + $0x48] sm:$0xff] }
  0x4c   :  { %716 = vperm.xlu0 %1200, %v692_v53   ;;  %v298_v53 = vld [vmem:[%s1683_s4 + $0x40] sm:$0xff] }
  0x82   :  { %v69_v56 = vpop.permute.xlu1 %68 }
  0x83   :  { %v59_v57 = vpop.permute.xlu0 %58 }
  0x86   :  { %v74_v58 = vpop.permute.xlu1 %73 }
  0x87   :  { %v64_v59 = vpop.permute.xlu0 %63 }
  0x8a   :  { %v84_v63 = vpop.permute.xlu1 %83 }
  0x8b   :  { %v79_v1 = vpop.permute.xlu0 %78 }
  0x8e   :  { %v94_v6 = vpop.permute.xlu1 %93 }
  0x8f   :  { %v89_v8 = vpop.permute.xlu0 %88 }
  0x92   :  { %v104_v17 = vpop.permute.xlu1 %103 }
  0x93   :  { %v99_v19 = vpop.permute.xlu0 %98 }
  0x96   :  { %v114_v28 = vpop.permute.xlu1 %113 }
  0x97   :  { %v109_v31 = vpop.permute.xlu0 %108 }
  0xdd   :  { %v1070_v60 = vpop.f32.mrb[0].mxu0 }
  0xde   :  { %v225_v61 = vadd.f32 %v1070_v60, %v64_v59  ;;  %v219_v62 = vpop.f32.mrb[1].mxu0  ;;  %v304_v59 = vld [vmem:[%s1683_s4 + $0x70] sm:$0xff]  ;;  %v305_v60 = vld [vmem:[%s1683_s4 + $0x78] sm:$0xff] }
  0xdf   :  { %v220_v0 = vadd.f32 %v219_v62, %v59_v57  ;;  %v302_v57 = vld [vmem:[%s1683_s4 + $0x60] sm:$0xff]  ;;  %v307_v62 = vld [vmem:[%s1683_s4 + $0x88] sm:$0xff] }
  0xe0   :  { %1202 = vtanh.f32 %v225_v61  ;;  %v306_v61 = vld [vmem:[%s1683_s4 + $0x80] sm:$0xff] }
  0xe1   :  { %1204 = vtanh.f32 %v220_v0  ;;  %v1073_v2 = vpop.f32.mrb[2].mxu0  ;;  %v309_v0 = vld [vmem:[%s1683_s4 + $0x98] sm:$0xff] }
  0xe2   :  { %v235_v3 = vadd.f32 %v1073_v2, %v74_v58  ;;  %v229_v4 = vpop.f32.mrb[3].mxu0  ;;  %v303_v58 = vld [vmem:[%s1683_s4 + $0x68] sm:$0xff] }
  0xe3   :  { %v230_v5 = vadd.f32 %v229_v4, %v69_v56  ;;  %v301_v56 = vld [vmem:[%s1683_s4 + $0x58] sm:$0xff]  ;;  %v677_v2 = vld [vmem:[%s1684_s6 + $0x8] sm:$0xff]  ;;  %v333_v4 = vpop.permute.xlu0 %332 }
  0xe4   :  { %1206 = vtanh.f32 %v235_v3  ;;  %1009 = vmatprep.mubr.msk.f32.mxu0 %vm724_vm2, %v677_v2  ;;  %v338_v3 = vpop.permute.xlu1 %337 }
  0xe5   :  { %1208 = vtanh.f32 %v230_v5  ;;  %v1076_v7 = vpop.f32.mrb[4].mxu0 }
  0xe6   :  { %v245_v9 = vadd.f32 %v1076_v7, %v84_v63  ;;  %v239_v10 = vpop.f32.mrb[5].mxu0  ;;  %v308_v63 = vld [vmem:[%s1683_s4 + $0x90] sm:$0xff] }
  0xe7   :  { %v240_v11 = vadd.f32 %v239_v10, %v79_v1  ;;  %v1295_v1 = vmov 0.0|0.0  }
  0xe8   :  { %1210 = vtanh.f32 %v245_v9  ;;  %1168 = vmatprep.subr.bf16.mxu0 %v1295_v1  ;;  %v348_v5 = vpop.permute.xlu1 %347 }
  0xe9   :  { %1212 = vtanh.f32 %v240_v11  ;;  %v1079_v12 = vpop.f32.mrb[6].mxu0 }
  0xea   :  { %v1203_v13 = vpop.eup %1202  ;;  %v255_v14 = vadd.f32 %v1079_v12, %v94_v6  ;;  %v249_v15 = vpop.f32.mrb[7].mxu0 }
  0xeb   :  { %v1205_v16 = vpop.eup %1204  ;;  %v250_v18 = vadd.f32 %v249_v15, %v89_v8  ;;  %v343_v6 = vpop.permute.xlu0 %342 }
  0xec   :  { %1214 = vtanh.f32 %v255_v14  ;;  %v1144_v20 = vpack.c.bf16 %v1203_v13, %v1205_v16  ;;  %v358_v7 = vpop.permute.xlu1 %357 }
  0xed   :  { %1216 = vtanh.f32 %v250_v18  ;;  %v1082_v21 = vpop.f32.mrb[8].mxu0 }
  0xee   :  { %v1207_v22 = vpop.eup %1206  ;;  %v265_v23 = vadd.f32 %v1082_v21, %v104_v17  ;;  %v259_v24 = vpop.f32.mrb[9].mxu0  ;;  %1145 = vmatprep.subr.bf16.mxu1 %v1144_v20 }
  0xef   :  { %v1209_v25 = vpop.eup %1208  ;;  %v260_v26 = vadd.f32 %v259_v24, %v99_v19  ;;  %1147 = vmatpush3.bf16.msra.mxu1 %v1144_v20  ;;  %v353_v8 = vpop.permute.xlu0 %352 }
  0xf0   :  { %1218 = vtanh.f32 %v265_v23  ;;  %v1148_v27 = vpack.c.bf16 %v1207_v22, %v1209_v25  ;;  %v368_v9 = vpop.permute.xlu1 %367 }
  0xf1   :  { %1220 = vtanh.f32 %v260_v26  ;;  %v1085_v29 = vpop.f32.mrb[10].mxu0 }
  0xf2   :  { %v1211_v30 = vpop.eup %1210  ;;  %v275_v32 = vadd.f32 %v1085_v29, %v114_v28  ;;  %v269_v33 = vpop.f32.mrb[11].mxu0  ;;  %1149 = vmatprep.subr.bf16.mxu1 %v1148_v27 }
  0xf3   :  { %v1213_v34 = vpop.eup %1212  ;;  %v270_v35 = vadd.f32 %v269_v33, %v109_v31  ;;  %1151 = vmatpush3.bf16.msra.mxu1 %v1148_v27  ;;  %v363_v11 = vpop.permute.xlu0 %362 }
  0xf4   :  { %1222 = vtanh.f32 %v275_v32  ;;  %v1152_v36 = vpack.c.bf16 %v1211_v30, %v1213_v34  ;;  %v378_v18 = vpop.permute.xlu1 %377 }
  0xf5   :  { %1224 = vtanh.f32 %v270_v35 }
  0xf6   :  { %v1215_v37 = vpop.eup %1214  ;;  %1153 = vmatprep.subr.bf16.mxu1 %v1152_v36 }
  0xf7   :  { %v1217_v38 = vpop.eup %1216  ;;  %1155 = vmatpush3.bf16.msra.mxu1 %v1152_v36  ;;  %v373_v20 = vpop.permute.xlu0 %372 }
  0xf8   :  { %v1156_v39 = vpack.c.bf16 %v1215_v37, %v1217_v38  ;;  %v388_v25 = vpop.permute.xlu1 %387 }
  0xfa   :  { %v1219_v40 = vpop.eup %1218  ;;  %1157 = vmatprep.subr.bf16.mxu1 %v1156_v39 }
  0xfb   :  { %v1221_v41 = vpop.eup %1220  ;;  %1159 = vmatpush3.bf16.msra.mxu1 %v1156_v39  ;;  %v383_v28 = vpop.permute.xlu0 %382 }
  0xfc   :  { %v1160_v42 = vpack.c.bf16 %v1219_v40, %v1221_v41  ;;  %v398_v39 = vpop.permute.xlu1 %397 }
  0xfe   :  { %v1223_v43 = vpop.eup %1222  ;;  %1161 = vmatprep.subr.bf16.mxu1 %v1160_v42 }
  0xff   :  { %v1225_v44 = vpop.eup %1224  ;;  %1163 = vmatpush3.bf16.msra.mxu1 %v1160_v42  ;;  %v393_v41 = vpop.permute.xlu0 %392 }
 0x100   :  { %v1164_v45 = vpack.c.bf16 %v1223_v43, %v1225_v44 }
 0x102   :  { %1165 = vmatprep.subr.bf16.mxu1 %v1164_v45 }
 0x103   :  { %1167 = vmatpush3.bf16.msra.mxu1 %v1164_v45 }
 0x106   :  { %1111 = vmatmul.mubr.msk.f32.vlgmr.msra.gmra.mrb[0].mxu1 %vm430_vm1, %v291_v46 }
 0x107   :  { %1113 = vmatprep.mubr.msk.f32.mxu1 %vm430_vm1, %v292_v47 }
 0x10a   :  { %1114 = vmatmul.mubr.msk.f32.gmra.mrb[2].mxu1 %vm430_vm1, %v293_v48 }
 0x10b   :  { %1116 = vmatprep.mubr.msk.f32.mxu1 %vm430_vm1, %v294_v49 }
 0x10e   :  { %1117 = vmatmul.mubr.msk.f32.gmra.mrb[4].mxu1 %vm430_vm1, %v295_v50  ;;  %v408_v50 = vpop.permute.xlu1 %407 }
 0x10f   :  { %1119 = vmatprep.mubr.msk.f32.mxu1 %vm430_vm1, %v296_v51 }
 0x112   :  { %1120 = vmatmul.mubr.msk.f32.gmra.mrb[6].mxu1 %vm430_vm1, %v297_v52 }
 0x113   :  { %1122 = vmatprep.mubr.msk.f32.mxu1 %vm430_vm1, %v298_v53  ;;  %v403_v53 = vpop.permute.xlu0 %402 }
 0x116   :  { %1123 = vmatmul.mubr.msk.f32.gmra.mrb[8].mxu1 %vm430_vm1, %v299_v54 }
 0x117   :  { %1125 = vmatprep.mubr.msk.f32.mxu1 %vm430_vm1, %v300_v55 }
 0x11a   :  { %1126 = vmatmul.mubr.msk.f32.gmra.mrb[10].mxu1 %vm430_vm1, %v301_v56 }
 0x11b   :  { %1128 = vmatprep.mubr.msk.f32.mxu1 %vm430_vm1, %v302_v57 }
 0x11e   :  { %1129 = vmatmul.mubr.msk.f32.gmra.mrb[12].mxu1 %vm430_vm1, %v303_v58 }
 0x11f   :  { %1131 = vmatprep.mubr.msk.f32.mxu1 %vm430_vm1, %v304_v59 }
 0x122   :  { %1132 = vmatmul.mubr.msk.f32.gmra.mrb[14].mxu1 %vm430_vm1, %v305_v60 }
 0x123   :  { %1134 = vmatprep.mubr.msk.f32.mxu1 %vm430_vm1, %v306_v61 }
 0x126   :  { %1135 = vmatmul.mubr.msk.f32.gmra.mrb[16].mxu1 %vm430_vm1, %v307_v62 }
 0x127   :  { %1137 = vmatprep.mubr.msk.f32.mxu1 %vm430_vm1, %v308_v63 }
 0x12a   :  { %1138 = vmatmul.mubr.msk.f32.gmra.mrb[18].mxu1 %vm430_vm1, %v309_v0  ;;  %v418_v0 = vpop.permute.xlu1 %417 }
 0x1d9   :  { %v1112_v10 = vpop.f32.mrb[0].mxu1 }
 0x1da   :  { %v563_v12 = vadd.f32 %v1112_v10, %v338_v3  ;;  %v557_v13 = vpop.f32.mrb[1].mxu1  ;;  %v413_v3 = vpop.permute.xlu0 %412 }
 0x1db   :  { %v558_v14 = vadd.f32 %v557_v13, %v333_v4 }
 0x1dc   :  { %1226 = vtanh.f32 %v563_v12  ;;  %v428_v12 = vpop.permute.xlu1 %427 }
 0x1dd   :  { %1228 = vtanh.f32 %v558_v14  ;;  %v1115_v15 = vpop.f32.mrb[2].mxu1 }
 0x1de   :  { %v573_v16 = vadd.f32 %v1115_v15, %v348_v5  ;;  %v567_v17 = vpop.f32.mrb[3].mxu1  ;;  %v423_v15 = vpop.permute.xlu0 %422 }
 0x1df   :  { %v568_v19 = vadd.f32 %v567_v17, %v343_v6 }
 0x1e0   :  { %1230 = vtanh.f32 %v573_v16 }
 0x1e1   :  { %1232 = vtanh.f32 %v568_v19  ;;  %v1118_v21 = vpop.f32.mrb[4].mxu1 }
 0x1e2   :  { %v583_v22 = vadd.f32 %v1118_v21, %v358_v7  ;;  %v577_v23 = vpop.f32.mrb[5].mxu1 }
 0x1e3   :  { %v578_v24 = vadd.f32 %v577_v23, %v353_v8 }
 0x1e4   :  { %1234 = vtanh.f32 %v583_v22 }
 0x1e5   :  { %1236 = vtanh.f32 %v578_v24  ;;  %v1121_v26 = vpop.f32.mrb[6].mxu1 }
 0x1e6   :  { %v1227_v27 = vpop.eup %1226  ;;  %v593_v29 = vadd.f32 %v1121_v26, %v368_v9  ;;  %v587_v30 = vpop.f32.mrb[7].mxu1 }
 0x1e7   :  { %v1229_v31 = vpop.eup %1228  ;;  %v588_v32 = vadd.f32 %v587_v30, %v363_v11  ;;  %v676_v30 = vld [vmem:[%s1684_s6] sm:$0xff] }
 0x1e8   :  { %1238 = vtanh.f32 %v593_v29  ;;  %v1169_v33 = vpack.c.bf16 %v1227_v27, %v1229_v31  ;;  %v679_v31 = vld [vmem:[%s1684_s6 + $0x18] sm:$0xff] }
 0x1e9   :  { %1240 = vtanh.f32 %v588_v32  ;;  %v1124_v34 = vpop.f32.mrb[8].mxu1  ;;  %v678_v32 = vld [vmem:[%s1684_s6 + $0x10] sm:$0xff] }
 0x1ea   :  { %v1231_v35 = vpop.eup %1230  ;;  %v603_v36 = vadd.f32 %v1124_v34, %v378_v18  ;;  %v597_v37 = vpop.f32.mrb[9].mxu1  ;;  %1170 = vmatpush1.bf16.msra.mxu0 %v1169_v33  ;;  %v680_v33 = vld [vmem:[%s1684_s6 + $0x20] sm:$0xff]  ;;  %v683_v34 = vld [vmem:[%s1684_s6 + $0x38] sm:$0xff] }
 0x1eb   :  { %v1233_v38 = vpop.eup %1232  ;;  %v598_v40 = vadd.f32 %v597_v37, %v373_v20  ;;  %1171 = vmatprep.subr.bf16.mxu0 %v1295_v1  ;;  %v684_v37 = vld [vmem:[%s1684_s6 + $0x40] sm:$0xff] }
 0x1ec   :  { %1242 = vtanh.f32 %v603_v36  ;;  %v1172_v42 = vpack.c.bf16 %v1231_v35, %v1233_v38  ;;  %v682_v35 = vld [vmem:[%s1684_s6 + $0x30] sm:$0xff]  ;;  %v685_v36 = vld [vmem:[%s1684_s6 + $0x48] sm:$0xff]  ;;  %v687_v38 = vld [vmem:[%s1684_s6 + $0x58] sm:$0xff] }
 0x1ed   :  { %1244 = vtanh.f32 %v598_v40  ;;  %v1127_v43 = vpop.f32.mrb[10].mxu1 }
 0x1ee   :  { %v1235_v44 = vpop.eup %1234  ;;  %v613_v45 = vadd.f32 %v1127_v43, %v388_v25  ;;  %v607_v46 = vpop.f32.mrb[11].mxu1  ;;  %1173 = vmatpush1.bf16.msra.mxu0 %v1172_v42 }
 0x1ef   :  { %v1237_v47 = vpop.eup %1236  ;;  %v608_v48 = vadd.f32 %v607_v46, %v383_v28  ;;  %1174 = vmatprep.subr.bf16.mxu0 %v1295_v1 }
 0x1f0   :  { %1246 = vtanh.f32 %v613_v45  ;;  %v1175_v49 = vpack.c.bf16 %v1235_v44, %v1237_v47  ;;  %v707_v44 = vpop.permute.xlu0 %706 }
 0x1f1   :  { %1248 = vtanh.f32 %v608_v48  ;;  %v1130_v51 = vpop.f32.mrb[12].mxu1 }
 0x1f2   :  { %v1239_v52 = vpop.eup %1238  ;;  %v623_v54 = vadd.f32 %v1130_v51, %v398_v39  ;;  %v617_v55 = vpop.f32.mrb[13].mxu1  ;;  %1176 = vmatpush1.bf16.msra.mxu0 %v1175_v49  ;;  %v686_v39 = vld [vmem:[%s1684_s6 + $0x50] sm:$0xff] }
 0x1f3   :  { %v1241_v56 = vpop.eup %1240  ;;  %v618_v57 = vadd.f32 %v617_v55, %v393_v41  ;;  %1177 = vmatprep.subr.bf16.mxu0 %v1295_v1  ;;  %v712_v49 = vpop.permute.xlu1 %711 }
 0x1f4   :  { %1250 = vtanh.f32 %v623_v54  ;;  %v1178_v58 = vpack.c.bf16 %v1239_v52, %v1241_v56 }
 0x1f5   :  { %1252 = vtanh.f32 %v618_v57  ;;  %v1133_v59 = vpop.f32.mrb[14].mxu1 }
 0x1f6   :  { %v1243_v60 = vpop.eup %1242  ;;  %v633_v61 = vadd.f32 %v1133_v59, %v408_v50  ;;  %v627_v62 = vpop.f32.mrb[15].mxu1  ;;  %1179 = vmatpush1.bf16.msra.mxu0 %v1178_v58 }
 0x1f7   :  { %v1245_v63 = vpop.eup %1244  ;;  %v628_v2 = vadd.f32 %v627_v62, %v403_v53  ;;  %1180 = vmatprep.subr.bf16.mxu0 %v1295_v1 }
 0x1f8   :  { %1254 = vtanh.f32 %v633_v61  ;;  %v1181_v4 = vpack.c.bf16 %v1243_v60, %v1245_v63 }
 0x1f9   :  { %1256 = vtanh.f32 %v628_v2  ;;  %v1136_v5 = vpop.f32.mrb[16].mxu1 }
 0x1fa   :  { %v1247_v6 = vpop.eup %1246  ;;  %v643_v7 = vadd.f32 %v1136_v5, %v418_v0  ;;  %v637_v8 = vpop.f32.mrb[17].mxu1  ;;  %1182 = vmatpush1.bf16.msra.mxu0 %v1181_v4 }
 0x1fb   :  { %v1249_v9 = vpop.eup %1248  ;;  %v638_v10 = vadd.f32 %v637_v8, %v413_v3  ;;  %1183 = vmatprep.subr.bf16.mxu0 %v1295_v1 }
 0x1fc   :  { %1258 = vtanh.f32 %v643_v7  ;;  %v1184_v11 = vpack.c.bf16 %v1247_v6, %v1249_v9 }
 0x1fd   :  { %1260 = vtanh.f32 %v638_v10  ;;  %v1139_v13 = vpop.f32.mrb[18].mxu1 }
 0x1fe   :  { %v1251_v14 = vpop.eup %1250  ;;  %v653_v16 = vadd.f32 %v1139_v13, %v428_v12  ;;  %v647_v17 = vpop.f32.mrb[19].mxu1  ;;  %1185 = vmatpush1.bf16.msra.mxu0 %v1184_v11 }
 0x1ff   :  { %v1253_v18 = vpop.eup %1252  ;;  %v648_v19 = vadd.f32 %v647_v17, %v423_v15  ;;  %1186 = vmatprep.subr.bf16.mxu0 %v1295_v1 }
 0x200   :  { %1262 = vtanh.f32 %v653_v16  ;;  %v1187_v20 = vpack.c.bf16 %v1251_v14, %v1253_v18 }
 0x201   :  { %1264 = vtanh.f32 %v648_v19 }
 0x202   :  { %v1255_v21 = vpop.eup %1254  ;;  %1188 = vmatpush1.bf16.msra.mxu0 %v1187_v20 }
 0x203   :  { %v1257_v22 = vpop.eup %1256  ;;  %1189 = vmatprep.subr.bf16.mxu0 %v1295_v1 }
 0x204   :  { %v1190_v23 = vpack.c.bf16 %v1255_v21, %v1257_v22 }
 0x206   :  { %v1259_v24 = vpop.eup %1258  ;;  %1191 = vmatpush1.bf16.msra.mxu0 %v1190_v23  ;;  %v697_v23 = vpop.permute.xlu0 %696 }
 0x207   :  { %v1261_v25 = vpop.eup %1260  ;;  %1192 = vmatprep.subr.bf16.mxu0 %v1295_v1 }
 0x208   :  { %v1193_v26 = vpack.c.bf16 %v1259_v24, %v1261_v25  ;;  %v870_v25 = vld [vmem:[%s1685_s1] sm:$0xff] }
 0x20a   :  { %v1263_v27 = vpop.eup %1262  ;;  %1194 = vmatpush1.bf16.msra.mxu0 %v1193_v26  ;;  %v702_v26 = vpop.permute.xlu1 %701 }
 0x20b   :  { %v1265_v28 = vpop.eup %1264  ;;  %1195 = vmatprep.subr.bf16.mxu0 %v1295_v1  ;;  %v681_v1 = vld [vmem:[%s1684_s6 + $0x28] sm:$0xff] }
 0x20c   :  { %v1196_v29 = vpack.c.bf16 %v1263_v27, %v1265_v28 }
 0x20e   :  { %1197 = vmatpush1.bf16.msra.mxu0 %v1196_v29  ;;  %v717_v29 = vpop.permute.xlu0 %716 }
 0x211   :  { %808 = vmatmul.mubr.f32.vlgmr.msra.gmra.mrb[12].mxu0 %v676_v30 }
 0x212   :  { %1010 = vmatprep.mubr.msk.f32.mxu0 %vm724_vm2, %v679_v31  ;;  %v871_v31 = vld [vmem:[%s1685_s1 + $0x8] sm:$0xff] }
 0x215   :  { %813 = vmatmul.mubr.f32.gmra.mrb[14].mxu0 %v678_v32 }
 0x216   :  { %1011 = vmatprep.mubr.msk.f32.mxu0 %vm724_vm2, %v681_v1 }
 0x219   :  { %818 = vmatmul.mubr.f32.gmra.mrb[16].mxu0 %v680_v33 }
 0x21a   :  { %1012 = vmatprep.mubr.msk.f32.mxu0 %vm724_vm2, %v683_v34 }
 0x21d   :  { %823 = vmatmul.mubr.f32.gmra.mrb[18].mxu0 %v682_v35 }
 0x21e   :  { %1013 = vmatprep.mubr.msk.f32.mxu0 %vm724_vm2, %v685_v36 }
 0x221   :  { %828 = vmatmul.mubr.f32.gmra.mrb[20].mxu0 %v684_v37 }
 0x222   :  { %1014 = vmatprep.mubr.msk.f32.mxu0 %vm724_vm2, %v687_v38  ;;  %v722_v38 = vpop.permute.xlu1 %721 }
 0x225   :  { %833 = vmatmul.mubr.f32.gmra.mrb[22].mxu0 %v686_v39 }
 0x2e4   :  { %v809_v40 = vpop.f32.mrb[12].mxu0 }
 0x2e5   :  { %v811_v41 = vpop.f32.mrb[13].mxu0  ;;  %v810_v24 = vadd.f32 %v809_v40, %v697_v23 }
 0x2e7   :  { %v872_v27 = vsub.f32 %v870_v25, %v810_v24 }
 0x2e8   :  { %v814_v42 = vpop.f32.mrb[14].mxu0 }
 0x2e9   :  { %v816_v43 = vpop.f32.mrb[15].mxu0  ;;  %v815_v30 = vadd.f32 %v814_v42, %v702_v26 }
 0x2eb   :  { %v873_v37 = vsub.f32 %v871_v31, %v815_v30 }
 0x2ec   :  { %v819_v45 = vpop.f32.mrb[16].mxu0 }
 0x2ed   :  { %v820_v46 = vadd.f32 %v819_v45, %v707_v44  ;;  %v821_v47 = vpop.f32.mrb[17].mxu0 }
 0x2ef   :  { %v840_v48 = vand.u32 2147483647, %v820_v46  ;;  %v838_v11 = vmax.f32 %v820_v46, 0.0 }
 0x2f0   :  { %v824_v50 = vpop.f32.mrb[18].mxu0 }
 0x2f1   :  { %v842_v51 = vsub.f32 0.0, %v840_v48  ;;  %v825_v52 = vadd.f32 %v824_v50, %v712_v49  ;;  %v826_v53 = vpop.f32.mrb[19].mxu0 }
 0x2f3   :  { %v844_v54 = vmul.f32 1.442695, %v842_v51  ;;  %v841_v55 = vand.u32 2147483647, %v825_v52  ;;  %v839_v19 = vmax.f32 %v825_v52, 0.0 }
 0x2f4   :  { %v829_v56 = vpop.f32.mrb[20].mxu0 }
 0x2f5   :  { %1266 = vpow2.f32 %v844_v54  ;;  %v843_v57 = vsub.f32 0.0, %v841_v55  ;;  %v831_v58 = vpop.f32.mrb[21].mxu0  ;;  %v830_v32 = vadd.f32 %v829_v56, %v717_v29 }
 0x2f7   :  { %v846_v59 = vmul.f32 1.442695, %v843_v57 }
 0x2f8   :  { %v834_v60 = vpop.f32.mrb[22].mxu0 }
 0x2f9   :  { %1268 = vpow2.f32 %v846_v59  ;;  %v836_v61 = vpop.f32.mrb[23].mxu0  ;;  %v835_v43 = vadd.f32 %v834_v60, %v722_v38 }
 0x2ff   :  { %v1267_v62 = vpop.eup %1266 }
 0x300   :  { %v848_v63 = vadd.f32 1.0, %v1267_v62  ;;  %v851_v3 = vmul.f32 -0.5, %v1267_v62  ;;  %v854_v6 = vand.u32 2147483647, %v1267_v62 }
 0x302   :  { %1270 = vlog2.f32 %v848_v63  ;;  %v852_v4 = vadd.f32 1.0, %v851_v3  ;;  %vm855_vm3 = vcmp.lt.f32.partialorder %v854_v6, 0.0004427343 }
 0x303   :  { %v1269_v0 = vpop.eup %1268 }
 0x304   :  { %v857_v2 = vadd.f32 1.0, %v1269_v0  ;;  %v860_v5 = vmul.f32 -0.5, %v1269_v0  ;;  %v853_v9 = vmul.f32 %v1267_v62, %v852_v4  ;;  %v863_v12 = vand.u32 2147483647, %v1269_v0 }
 0x306   :  { %1272 = vlog2.f32 %v857_v2  ;;  %v861_v10 = vadd.f32 1.0, %v860_v5  ;;  %vm864_vm4 = vcmp.lt.f32.partialorder %v863_v12, 0.0004427343 }
 0x308   :  { %v862_v17 = vmul.f32 %v1269_v0, %v861_v10 }
 0x30c   :  { %v1271_v7 = vpop.eup %1270 }
 0x30d   :  { %v850_v8 = vmul.f32 0.6931472, %v1271_v7 }
 0x30f   :  { %v856_v13 = vsel %vm855_vm3, %v853_v9, %v850_v8 }
 0x310   :  { %v1273_v14 = vpop.eup %1272  ;;  %v866_v15 = vadd.f32 %v856_v13, %v838_v11 }
 0x311   :  { %v859_v16 = vmul.f32 0.6931472, %v1273_v14 }
 0x312   :  { %v868_v18 = vmul.f32 10.0, %v866_v15 }
 0x313   :  { %v865_v20 = vsel %vm864_vm4, %v862_v17, %v859_v16 }
 0x314   :  { %1274 = vrcp.f32 %v868_v18  ;;  %v867_v21 = vadd.f32 %v865_v20, %v839_v19 }
 0x315   :  { %1276 = vlog2.f32 %v868_v18 }
 0x316   :  { %v869_v22 = vmul.f32 10.0, %v867_v21 }
 0x318   :  { %1278 = vrcp.f32 %v869_v22 }
 0x319   :  { %1280 = vlog2.f32 %v869_v22 }
 0x31e   :  { %v1275_v28 = vpop.eup %1274 }
 0x31f   :  { %v878_v1 = vmul.f32 %v1275_v28, %v872_v27  ;;  %v1277_v33 = vpop.eup %1276 }
 0x320   :  { %v887_v39 = vmul.f32 0.6931472, %v1277_v33 }
 0x321   :  { %v1650_v34 = vmul.f32 %v878_v1, %v830_v32  ;;  %v882_v35 = vmul.f32 0.5, %v878_v1 }
 0x322   :  { %v1279_v36 = vpop.eup %1278 }
 0x323   :  { %v884_v40 = vmul.f32 %v882_v35, %v878_v1  ;;  %v892_v41 = vand.u32 2147483647, %v1650_v34  ;;  %v879_v42 = vmul.f32 %v1279_v36, %v873_v37  ;;  %v1281_v44 = vpop.eup %1280  ;;  %v963_v50 = vsel %vm950_vm5, %v1650_v34, inf }
 0x324   :  { %v889_v51 = vmul.f32 0.6931472, %v1281_v44  ;;  %vm930_vm7 = vcmp.lt.f32.partialorder %v1650_v34, 0.0 }
 0x325   :  { %v1653_v45 = vadd.f32 %v887_v39, %v884_v40  ;;  %v894_v46 = vmul.f32 0.70710677, %v892_v41  ;;  %v1655_v47 = vmul.f32 %v879_v42, %v835_v43  ;;  %v883_v48 = vmul.f32 0.5, %v879_v42 }
 0x327   :  { %v896_v49 = vmul.f32 0.3275911, %v894_v46  ;;  %v885_v52 = vmul.f32 %v883_v48, %v879_v42  ;;  %v893_v53 = vand.u32 2147483647, %v1655_v47  ;;  %v964_v54 = vsel %vm950_vm5, %v1655_v47, inf }
 0x328   :  { %v965_v56 = vmin.f32 %v963_v50, %v964_v54  ;;  %v922_v2 = vsub.f32 0.0, %v894_v46  ;;  %vm931_vm8 = vcmp.lt.f32.partialorder %v1655_v47, 0.0 }
 0x329   :  { %v898_v55 = vadd.f32 1.0, %v896_v49  ;;  %v1662_v57 = vadd.f32 %v889_v51, %v885_v52  ;;  %v895_v58 = vmul.f32 0.70710677, %v893_v53 }
 0x32a   :  { %v966_v59 = vrot.slane %v965_v56, 4  ;;  %v924_v7 = vmul.f32 %v922_v2, %v894_v46 }
 0x32b   :  { %1282 = vrcp.f32 %v898_v55  ;;  %v897_v60 = vmul.f32 0.3275911, %v895_v58  ;;  %v923_v9 = vsub.f32 0.0, %v895_v58 }
 0x32c   :  { %v967_v61 = vmin.f32 %v965_v56, %v966_v59  ;;  %v926_v12 = vmul.f32 1.442695, %v924_v7  ;;  %v940_v43 = vsel %vm930_vm7, %v924_v7, 0.0 }
 0x32d   :  { %v899_v62 = vadd.f32 1.0, %v897_v60  ;;  %v925_v15 = vmul.f32 %v923_v9, %v895_v58 }
 0x32e   :  { %v968_v63 = vrot.slane %v967_v61, 2 }
 0x32f   :  { %1284 = vrcp.f32 %v899_v62  ;;  %v928_v20 = vmul.f32 1.442695, %v925_v15  ;;  %v941_v49 = vsel %vm931_vm8, %v925_v15, 0.0 }
 0x330   :  { %v969_v0 = vmin.f32 %v967_v61, %v968_v63  ;;  %1286 = vpow2.f32 %v926_v12 }
 0x331   :  { %1288 = vpow2.f32 %v928_v20 }
 0x332   :  { %v970_v3 = vrot.slane %v969_v0, 1 }
 0x334   :  { %v971_v5 = vmin.f32 %v969_v0, %v970_v3 }
 0x335   :  { %v1283_v4 = vpop.eup %1282 }
 0x336   :  { %v904_v6 = vmul.f32 1.0614054, %v1283_v4  ;;  %972 = vst.msk [vmem:[%s1686_s8 + $0x1] sm:$0x1] %vm961_vm6, %v971_v5 }
 0x338   :  { %v906_v8 = vadd.f32 -1.4531521, %v904_v6 }
 0x339   :  { %v1285_v10 = vpop.eup %1284 }
 0x33a   :  { %v908_v11 = vmul.f32 %v1283_v4, %v906_v8  ;;  %v905_v13 = vmul.f32 1.0614054, %v1285_v10  ;;  %v1287_v29 = vpop.eup %1286 }
 0x33b   :  { %v1289_v35 = vpop.eup %1288 }
 0x33c   :  { %v910_v14 = vadd.f32 1.4214138, %v908_v11  ;;  %v907_v16 = vadd.f32 -1.4531521, %v905_v13 }
 0x33e   :  { %v912_v17 = vmul.f32 %v1283_v4, %v910_v14  ;;  %v909_v18 = vmul.f32 %v1285_v10, %v907_v16 }
 0x340   :  { %v914_v19 = vadd.f32 -0.28449672, %v912_v17  ;;  %v911_v21 = vadd.f32 1.4214138, %v909_v18 }
 0x342   :  { %v916_v22 = vmul.f32 %v1283_v4, %v914_v19  ;;  %v913_v23 = vmul.f32 %v1285_v10, %v911_v21 }
 0x344   :  { %v918_v24 = vadd.f32 0.2548296, %v916_v22  ;;  %v915_v25 = vadd.f32 -0.28449672, %v913_v23 }
 0x346   :  { %v920_v26 = vmul.f32 %v1283_v4, %v918_v24  ;;  %v917_v27 = vmul.f32 %v1285_v10, %v915_v25 }
 0x348   :  { %v932_v28 = vmul.f32 0.5, %v920_v26  ;;  %v919_v30 = vadd.f32 0.2548296, %v917_v27 }
 0x34a   :  { %v934_v31 = vmul.f32 %v1287_v29, %v932_v28  ;;  %v921_v32 = vmul.f32 %v1285_v10, %v919_v30 }
 0x34c   :  { %v936_v1 = vsub.f32 1.0, %v934_v31  ;;  %v933_v33 = vmul.f32 0.5, %v921_v32 }
 0x34e   :  { %v938_v36 = vsel %vm930_vm7, %v932_v28, %v936_v1  ;;  %v935_v37 = vmul.f32 %v1289_v35, %v933_v33 }
 0x34f   :  { %1290 = vlog2.f32 %v938_v36 }
 0x350   :  { %v937_v38 = vsub.f32 1.0, %v935_v37 }
 0x352   :  { %v939_v39 = vsel %vm931_vm8, %v933_v33, %v937_v38 }
 0x353   :  { %1292 = vlog2.f32 %v939_v39 }
 0x359   :  { %v1291_v40 = vpop.eup %1290 }
 0x35a   :  { %v943_v41 = vmul.f32 0.6931472, %v1291_v40 }
 0x35c   :  { %v946_v42 = vadd.f32 %v943_v41, %v940_v43 }
 0x35d   :  { %v1293_v44 = vpop.eup %1292 }
 0x35e   :  { %v948_v46 = vsub.f32 %v1653_v45, %v946_v42  ;;  %v945_v48 = vmul.f32 0.6931472, %v1293_v44 }
 0x360   :  { %v947_v34 = vadd.f32 %v945_v48, %v941_v49  ;;  %v951_v51 = vsel %vm950_vm5, %v948_v46, 0.0 }
 0x362   :  { %v949_v50 = vsub.f32 %v1662_v57, %v947_v34 }
 0x364   :  { %v952_v52 = vsel %vm950_vm5, %v949_v50, 0.0 }
 0x365   :  { %v953_v53 = vadd.f32 %v952_v52, %v951_v51 }
 0x367   :  { %v954_v47 = vrot.slane %v953_v53, 4 }
 0x369   :  { %v955_v54 = vadd.f32 %v954_v47, %v953_v53 }
 0x36b   :  { %v956_v55 = vrot.slane %v955_v54, 2 }
 0x36d   :  { %v957_v56 = vadd.f32 %v956_v55, %v955_v54 }
 0x36f   :  { %v958_v58 = vrot.slane %v957_v56, 1 }
 0x371   :  { %v959_v59 = vadd.f32 %v958_v58, %v957_v56 }
 0x373   :  { %v960_v60 = vmul.f32 0.0625, %v959_v59 }
 0x375   :  { %962 = vst.msk [vmem:[%s1686_s8] sm:$0x1] %vm961_vm6, %v960_v60 }

</bundles_post_ra>
